<compile_context>
chip_gen: v6e
topology: v6e:2x2x1
jax: 0.10.0
libtpu: 0.0.40
codegen_flags: <defaults>
</compile_context>

<pallas_src>
import functools

import jax
import jax.numpy as jnp
from jax import lax
from jax.experimental import pallas as pl
from jax.experimental.pallas import tpu as pltpu


def cha_kernel(x_ref, w1_ref, b1_ref, w2_ref, b2_ref, o_ref,
               max_acc, sum_acc, *, inv_hw):
    k = pl.program_id(1)

    @pl.when(k == 0)
    def _():
        max_acc[...] = jnp.full(max_acc.shape, -jnp.inf, max_acc.dtype)
        sum_acc[...] = jnp.zeros(sum_acc.shape, sum_acc.dtype)

    # Per-tile pooling work: purely elementwise/XLU max + add (no divide).
    x = x_ref[...].astype(jnp.float32)                        # (Bt, C, Tk)
    max_acc[...] = jnp.maximum(max_acc[...], jnp.max(x, axis=-1))
    sum_acc[...] = sum_acc[...] + jnp.sum(x, axis=-1)

    @pl.when(k == pl.num_programs(1) - 1)
    def _():
        m = max_acc[...]                                      # (Bt, C)
        a = sum_acc[...] * inv_hw                             # mean = sum * 1/(H*W)
        v = jnp.concatenate([m, a], axis=0)                   # (2*Bt, C)

        w1 = w1_ref[...].astype(jnp.float32)                  # (C, C) PyTorch (out, in)
        w2 = w2_ref[...].astype(jnp.float32)
        b1 = b1_ref[...].astype(jnp.float32)                  # (1, C)
        b2 = b2_ref[...].astype(jnp.float32)

        # v @ W.T  ==  contract last dim of v with last dim of W (no transpose op).
        dn = (((1,), (1,)), ((), ()))
        h = lax.dot_general(v, w1, dn, preferred_element_type=jnp.float32) + b1
        h = jnp.maximum(h, 0.0)                               # ReLU
        z = lax.dot_general(h, w2, dn, preferred_element_type=jnp.float32) + b2

        bt = m.shape[0]
        o_ref[...] = jax.nn.sigmoid(z[:bt] + z[bt:]).astype(o_ref.dtype)


def _pick_hw_tile(hw):
    """Largest lane tile (multiple of 128, prefer >=512) that divides H*W."""
    for tk in (2048, 1024, 512, 256, 128):
        if hw % tk == 0:
            return tk
    return hw  # fall back to a single full-extent spatial block


def cha_forward(x, w1, b1, w2, b2, s):
    """x: (B, C, H, W) NCHW. Returns (B, C, 1, 1) float32 attention weights."""
    B, C, H, W = x.shape
    # linear1 has in_features == outchannel, so the flattened pooled tensor must
    # equal (B, C), i.e. the pooling must be global.
    assert H == s and W == s, "Cha requires global pooling: s == H == W"
    # TODO(synk): non-global pooling (s < H) is shape-inconsistent with
    # linear1(outchannel, outchannel) unless C*(H//s)*(W//s) == outchannel.

    hw = H * W
    x3 = x.reshape(B, C, hw)                    # keep source dtype (bf16 stays bf16)
    b1r = jnp.asarray(b1).reshape(1, C)
    b2r = jnp.asarray(b2).reshape(1, C)

    tk = _pick_hw_tile(hw)
    bt = B if B <= 8 else 8
    grid = (pl.cdiv(B, bt), hw // tk)

    itemsize = jnp.dtype(x3.dtype).itemsize
    # VMEM footprint: double-buffered x tiles + resident weights/biases +
    # accumulators + output buffers, with headroom.  Clamp to stay well under
    # the smallest physical VMEM (v7x: 64 MiB/TC).
    needed = (2 * bt * C * tk * itemsize
              + 2 * 2 * (C * C + C) * 4
              + 2 * bt * C * 4
              + 2 * bt * C * 4)
    vmem_limit = int(min(max(4 * needed, 16 * 1024 * 1024), 56 * 1024 * 1024))

    kern = functools.partial(cha_kernel, inv_hw=1.0 / float(hw))

    out = pl.pallas_call(
        kern,
        out_shape=jax.ShapeDtypeStruct((B, C), jnp.float32),
        grid_spec=pltpu.PrefetchScalarGridSpec(
            num_scalar_prefetch=0,
            grid=grid,
            in_specs=[
                # x tiles: pipelined over (batch tile, spatial tile).
                pl.BlockSpec((bt, C, tk), lambda b, k: (b, 0, k)),
                # Weights/biases: constant block index -> fetched once, resident.
                pl.BlockSpec((C, C), lambda b, k: (0, 0)),
                pl.BlockSpec((1, C), lambda b, k: (0, 0)),
                pl.BlockSpec((C, C), lambda b, k: (0, 0)),
                pl.BlockSpec((1, C), lambda b, k: (0, 0)),
            ],
            out_specs=pl.BlockSpec((bt, C), lambda b, k: (b, 0)),
            scratch_shapes=[pltpu.VMEM((bt, C), jnp.float32),   # running max
                            pltpu.VMEM((bt, C), jnp.float32)],  # running sum
        ),
        compiler_params=pltpu.CompilerParams(
            dimension_semantics=("parallel", "arbitrary"),
            vmem_limit_bytes=vmem_limit,
        ),
        cost_estimate=pl.CostEstimate(
            flops=int(2 * B * C * hw + 8 * B * C * C),
            transcendentals=int(B * C),
            bytes_accessed=int(B * C * hw * itemsize
                               + 2 * (C * C + C) * 4
                               + B * C * 4),
        ),
    )(x3, w1, b1r, w2, b2r)
    return out.reshape(B, C, 1, 1)


def cha_reference(x, w1, b1, w2, b2):
    """Pure-JAX reference matching the PyTorch forward."""
    B, C, H, W = x.shape
    xf = x.astype(jnp.float32).reshape(B, C, H * W)
    m = jnp.max(xf, axis=-1)
    a = jnp.mean(xf, axis=-1)

    def mlp(v):
        h = jnp.maximum(v @ w1.T + b1, 0.0)
        return h @ w2.T + b2

    t = mlp(m) + mlp(a)
    return jax.nn.sigmoid(t).reshape(B, C, 1, 1)


if __name__ == "__main__":
    B, C, H, W = 2, 4, 16, 16
    s = 16  # pooling window == spatial size (global pooling)

    key = jax.random.PRNGKey(0)
    kx, k1, k2, k3, k4 = jax.random.split(key, 5)

    x = jax.random.normal(kx, (B, C, H, W), dtype=jnp.float32)
    # nn.Linear(outchannel, outchannel): weights (out, in); biases (out,)
    bound = 1.0 / jnp.sqrt(C)
    w1 = jax.random.uniform(k1, (C, C), jnp.float32, -bound, bound)
    b1 = jax.random.uniform(k2, (C,), jnp.float32, -bound, bound)
    w2 = jax.random.uniform(k3, (C, C), jnp.float32, -bound, bound)
    b2 = jax.random.uniform(k4, (C,), jnp.float32, -bound, bound)

    out = cha_forward(x, w1, b1, w2, b2, s)
    out = jax.block_until_ready(out)

    ref = cha_reference(x, w1, b1, w2, b2)
    assert out.shape == (B, C, 1, 1)
    assert jnp.allclose(out, ref, atol=1e-5, rtol=1e-5), "mismatch vs reference"

    print("KERNEL_OK")
</pallas_src>

<mosaic_0001>
module attributes {stable_mosaic.version = 11 : i64} {
  func.func @cha_kernel(%arg0: i32, %arg1: i32, %arg2: memref<2x4x256xf32, #tpu.memory_space<vmem>>, %arg3: memref<4x4xf32, #tpu.memory_space<vmem>>, %arg4: memref<1x4xf32, #tpu.memory_space<vmem>>, %arg5: memref<4x4xf32, #tpu.memory_space<vmem>>, %arg6: memref<1x4xf32, #tpu.memory_space<vmem>>, %arg7: memref<2x4xf32, #tpu.memory_space<vmem>>, %arg8: memref<2x4xf32, #tpu.memory_space<vmem>>, %arg9: memref<2x4xf32, #tpu.memory_space<vmem>>) attributes {dimension_semantics = [#tpu.dimension_semantics<parallel>, #tpu.dimension_semantics<arbitrary>], iteration_bounds = array<i64: 1, 1>, scalar_prefetch = 0 : i64, scratch_operands = 2 : i64, tpu.core_type = #tpu.core_type<tc>, window_params = [{transform_indices = @transform_0, window_bounds = array<i64: 2, 4, 256>}, {pipeline_mode = #tpu.pipeline_mode<synchronous>, transform_indices = @transform_1, window_bounds = array<i64: 4, 4>}, {pipeline_mode = #tpu.pipeline_mode<synchronous>, transform_indices = @transform_2, window_bounds = array<i64: 1, 4>}, {pipeline_mode = #tpu.pipeline_mode<synchronous>, transform_indices = @transform_3, window_bounds = array<i64: 4, 4>}, {pipeline_mode = #tpu.pipeline_mode<synchronous>, transform_indices = @transform_4, window_bounds = array<i64: 1, 4>}, {transform_indices = @transform_5, window_bounds = array<i64: 2, 4>}]} {
    %c0_i32 = arith.constant 0 : i32
    %0 = arith.cmpi eq, %arg1, %c0_i32 : i32
    %1 = arith.extui %0 : i1 to i32
    %c0_i32_0 = arith.constant 0 : i32
    %2 = arith.cmpi ne, %1, %c0_i32_0 : i32
    scf.if %2 {
      %cst_14 = arith.constant 0xFF800000 : f32
      %15 = vector.broadcast %cst_14 : f32 to vector<2x4xf32>
      %c0_15 = arith.constant 0 : index
      %c0_16 = arith.constant 0 : index
      %16 = vector.load %arg8[%c0_15, %c0_16] : memref<2x4xf32, #tpu.memory_space<vmem>>, vector<2x4xf32>
      tpu.vector_store %arg8[%c0_15, %c0_16], %15 {strides = array<i32>} : memref<2x4xf32, #tpu.memory_space<vmem>>, vector<2x4xf32>,
      %cst_17 = arith.constant 0.000000e+00 : f32
      %17 = vector.broadcast %cst_17 : f32 to vector<2x4xf32>
      %c0_18 = arith.constant 0 : index
      %c0_19 = arith.constant 0 : index
      %18 = vector.load %arg9[%c0_18, %c0_19] : memref<2x4xf32, #tpu.memory_space<vmem>>, vector<2x4xf32>
      tpu.vector_store %arg9[%c0_18, %c0_19], %17 {strides = array<i32>} : memref<2x4xf32, #tpu.memory_space<vmem>>, vector<2x4xf32>,
    } else {
    }
    %c0 = arith.constant 0 : index
    %c0_1 = arith.constant 0 : index
    %c0_2 = arith.constant 0 : index
    %3 = vector.load %arg2[%c0, %c0_1, %c0_2] : memref<2x4x256xf32, #tpu.memory_space<vmem>>, vector<2x4x256xf32>
    %c0_3 = arith.constant 0 : index
    %c0_4 = arith.constant 0 : index
    %4 = vector.load %arg8[%c0_3, %c0_4] : memref<2x4xf32, #tpu.memory_space<vmem>>, vector<2x4xf32>
    %cst = arith.constant dense<0xFF800000> : vector<2x4xf32>
    %5 = vector.multi_reduction <maximumf>, %3, %cst [2] : vector<2x4x256xf32> to vector<2x4xf32>
    %6 = arith.maximumf %4, %5 : vector<2x4xf32>
    %c0_5 = arith.constant 0 : index
    %c0_6 = arith.constant 0 : index
    %7 = vector.load %arg8[%c0_5, %c0_6] : memref<2x4xf32, #tpu.memory_space<vmem>>, vector<2x4xf32>
    tpu.vector_store %arg8[%c0_5, %c0_6], %6 {strides = array<i32>} : memref<2x4xf32, #tpu.memory_space<vmem>>, vector<2x4xf32>,
    %c0_7 = arith.constant 0 : index
    %c0_8 = arith.constant 0 : index
    %8 = vector.load %arg9[%c0_7, %c0_8] : memref<2x4xf32, #tpu.memory_space<vmem>>, vector<2x4xf32>
    %cst_9 = arith.constant dense<0.000000e+00> : vector<2x4xf32>
    %9 = vector.multi_reduction <add>, %3, %cst_9 [2] : vector<2x4x256xf32> to vector<2x4xf32>
    %10 = arith.addf %8, %9 : vector<2x4xf32>
    %c0_10 = arith.constant 0 : index
    %c0_11 = arith.constant 0 : index
    %11 = vector.load %arg9[%c0_10, %c0_11] : memref<2x4xf32, #tpu.memory_space<vmem>>, vector<2x4xf32>
    tpu.vector_store %arg9[%c0_10, %c0_11], %10 {strides = array<i32>} : memref<2x4xf32, #tpu.memory_space<vmem>>, vector<2x4xf32>,
    %c0_i32_12 = arith.constant 0 : i32
    %12 = arith.cmpi eq, %arg1, %c0_i32_12 : i32
    %13 = arith.extui %12 : i1 to i32
    %c0_i32_13 = arith.constant 0 : i32
    %14 = arith.cmpi ne, %13, %c0_i32_13 : i32
    scf.if %14 {
      %c0_14 = arith.constant 0 : index
      %c0_15 = arith.constant 0 : index
      %15 = vector.load %arg8[%c0_14, %c0_15] : memref<2x4xf32, #tpu.memory_space<vmem>>, vector<2x4xf32>
      %c0_16 = arith.constant 0 : index
      %c0_17 = arith.constant 0 : index
      %16 = vector.load %arg9[%c0_16, %c0_17] : memref<2x4xf32, #tpu.memory_space<vmem>>, vector<2x4xf32>
      %cst_18 = arith.constant 3.906250e-03 : f32
      %17 = vector.broadcast %cst_18 : f32 to vector<2x4xf32>
      %18 = arith.mulf %16, %17 : vector<2x4xf32>
      %19 = tpu.concatenate %15, %18 in 0 : vector<2x4xf32>, vector<2x4xf32> -> vector<4x4xf32>
      %c0_19 = arith.constant 0 : index
      %c0_20 = arith.constant 0 : index
      %20 = vector.load %arg3[%c0_19, %c0_20] : memref<4x4xf32, #tpu.memory_space<vmem>>, vector<4x4xf32>
      %c0_21 = arith.constant 0 : index
      %c0_22 = arith.constant 0 : index
      %21 = vector.load %arg5[%c0_21, %c0_22] : memref<4x4xf32, #tpu.memory_space<vmem>>, vector<4x4xf32>
      %c0_23 = arith.constant 0 : index
      %c0_24 = arith.constant 0 : index
      %22 = vector.load %arg4[%c0_23, %c0_24] : memref<1x4xf32, #tpu.memory_space<vmem>>, vector<1x4xf32>
      %c0_25 = arith.constant 0 : index
      %c0_26 = arith.constant 0 : index
      %23 = vector.load %arg6[%c0_25, %c0_26] : memref<1x4xf32, #tpu.memory_space<vmem>>, vector<1x4xf32>
      %cst_27 = arith.constant dense<0.000000e+00> : vector<4x4xf32>
      %24 = tpu.matmul %19, %20, %cst_27 {dimension_numbers = #tpu.dot_dimension_numbers<[1], [1], [0], [0], [0, 0, 1, 0], [], []>} : vector<4x4xf32>, vector<4x4xf32>, vector<4x4xf32> -> vector<4x4xf32>
      %25 = vector.broadcast %22 : vector<1x4xf32> to vector<4x4xf32>
      %26 = arith.addf %24, %25 : vector<4x4xf32>
      %cst_28 = arith.constant 0.000000e+00 : f32
      %27 = vector.broadcast %cst_28 : f32 to vector<4x4xf32>
      %28 = arith.maximumf %26, %27 : vector<4x4xf32>
      %cst_29 = arith.constant dense<0.000000e+00> : vector<4x4xf32>
      %29 = tpu.matmul %28, %21, %cst_29 {dimension_numbers = #tpu.dot_dimension_numbers<[1], [1], [0], [0], [0, 0, 1, 0], [], []>} : vector<4x4xf32>, vector<4x4xf32>, vector<4x4xf32> -> vector<4x4xf32>
      %30 = vector.broadcast %23 : vector<1x4xf32> to vector<4x4xf32>
      %31 = arith.addf %29, %30 : vector<4x4xf32>
      %32 = vector.extract_strided_slice %31 {offsets = [0, 0], sizes = [2, 4], strides = [1, 1]} : vector<4x4xf32> to vector<2x4xf32>
      %33 = vector.extract_strided_slice %31 {offsets = [2, 0], sizes = [2, 4], strides = [1, 1]} : vector<4x4xf32> to vector<2x4xf32>
      %34 = arith.addf %32, %33 : vector<2x4xf32>
      %35 = arith.negf %34 : vector<2x4xf32>
      %36 = math.exp %35 : vector<2x4xf32>
      %cst_30 = arith.constant 1.000000e+00 : f32
      %37 = vector.broadcast %cst_30 : f32 to vector<2x4xf32>
      %38 = arith.addf %37, %36 : vector<2x4xf32>
      %39 = arith.divf %37, %38 : vector<2x4xf32>
      %c0_31 = arith.constant 0 : index
      %c0_32 = arith.constant 0 : index
      %40 = vector.load %arg7[%c0_31, %c0_32] : memref<2x4xf32, #tpu.memory_space<vmem>>, vector<2x4xf32>
      tpu.vector_store %arg7[%c0_31, %c0_32], %39 {strides = array<i32>} : memref<2x4xf32, #tpu.memory_space<vmem>>, vector<2x4xf32>,
    } else {
    }
    return
  }
  func.func @transform_0(%arg0: i32, %arg1: i32) -> (i32, i32, i32) {
    %c0_i32 = arith.constant 0 : i32
    %c0_i32_0 = arith.constant 0 : i32
    return %arg0, %c0_i32, %arg1 : i32, i32, i32
  }
  func.func @transform_1(%arg0: i32, %arg1: i32) -> (i32, i32) {
    %c0_i32 = arith.constant 0 : i32
    %c0_i32_0 = arith.constant 0 : i32
    %c0_i32_1 = arith.constant 0 : i32
    return %c0_i32, %c0_i32_0 : i32, i32
  }
  func.func @transform_2(%arg0: i32, %arg1: i32) -> (i32, i32) {
    %c0_i32 = arith.constant 0 : i32
    %c0_i32_0 = arith.constant 0 : i32
    %c0_i32_1 = arith.constant 0 : i32
    return %c0_i32, %c0_i32_0 : i32, i32
  }
  func.func @transform_3(%arg0: i32, %arg1: i32) -> (i32, i32) {
    %c0_i32 = arith.constant 0 : i32
    %c0_i32_0 = arith.constant 0 : i32
    %c0_i32_1 = arith.constant 0 : i32
    return %c0_i32, %c0_i32_0 : i32, i32
  }
  func.func @transform_4(%arg0: i32, %arg1: i32) -> (i32, i32) {
    %c0_i32 = arith.constant 0 : i32
    %c0_i32_0 = arith.constant 0 : i32
    %c0_i32_1 = arith.constant 0 : i32
    return %c0_i32, %c0_i32_0 : i32, i32
  }
  func.func @transform_5(%arg0: i32, %arg1: i32) -> (i32, i32) {
    %c0_i32 = arith.constant 0 : i32
    %c0_i32_0 = arith.constant 0 : i32
    return %arg0, %c0_i32 : i32, i32
  }
}

</mosaic_0001>

<bundles_post_ra>
// kernel: tpu_custom_call.1
= control target key start
LH: loop header
LB: loop body
LE: loop exit
PB: predicated region body
PF: predicated region fallthrough
CT: control target
= control target key end

     0   :  { %10 = vsyncpa [#allocation5], 0  ;;  %s491_s0 = inlined_call_operand.hbm [shape: f32[2,4,256], index: 0, kind: input, shape index: {}]   ;;  %s492_s1 = inlined_call_operand.hbm [shape: f32[4,4], index: 1, kind: input, shape index: {}]   ;;  %s493_s2 = inlined_call_operand.vmem [shape: f32[1,4], index: 2, kind: input, shape index: {}]   ;;  %s494_s3 = inlined_call_operand.vmem [shape: f32[4,4], index: 3, kind: input, shape index: {}]   ;;  %s495_s4 = inlined_call_operand.vmem [shape: f32[1,4], index: 4, kind: input, shape index: {}]   ;;  %s496_s5 = inlined_call_operand.hbm [shape: f32[2,4], index: 5, kind: output, shape index: {}]  }
   0x1   :  { %11 = vsyncpa [#allocation8], 0 }
   0x2   :  { %12 = vsyncpa [#allocation6], 0  ;;  %s426_s18 = smov [#allocation4]  }
   0x3   :  { %s18_s19 = sshll.u32 %s426_s18, 4  ;;  %s19_s19 = int_to_ptr.vmem [resolvable:$true] %s18_s19 }
   0x4   :  { %s368_s20 = scalar_lea.vmem %s19_s19, 256  ;;  %p373_p1 = scmp.lt.s32.totalorder %s19_s19, %s19_s19 }
   0x5   :  { %p369_p0 = scmp.ne.s32.totalorder %s19_s19, %s368_s20  ;;  %p374_p2 = scmp.lt.s32.totalorder %s368_s20, %s368_s20 }
   0x7   :  { %p375_p3 = por %p374_p2, %p373_p1 }
   0x9   :  { %p376_p4 = pnand %p375_p3, %p369_p0 }
   0xb   :  { %379 = shalt.err (!%p376_p4)
}
   0xc   :  { %s427_s21 = smov 128   ;;  %s428_s22 = smov 8  }
   0xd   :  { %24 = dma.hbm_to_vmem [thread:$0]  %s491_s0, 256, %s19_s19, [#allocation5], %s427_s21, %s427_s21, %s428_s22  }
   0xe   :  { %s429_s25 = smov [#allocation7]  }
   0xf   :  { %s31_s26 = sshll.u32 %s429_s25, 4  ;;  %s32_s26 = int_to_ptr.vmem [resolvable:$true] %s31_s26 }
  0x10   :  { %s388_s27 = scalar_lea.vmem %s32_s26, 64  ;;  %p393_p6 = scmp.lt.s32.totalorder %s32_s26, %s32_s26 }
  0x11   :  { %p389_p5 = scmp.ne.s32.totalorder %s32_s26, %s388_s27  ;;  %p394_p7 = scmp.lt.s32.totalorder %s388_s27, %s388_s27 }
  0x13   :  { %p395_p8 = por %p394_p7, %p393_p6 }
  0x15   :  { %p396_p9 = pnand %p395_p8, %p389_p5 }
  0x17   :  { %399 = shalt.err (!%p396_p9)
}
  0x18   :  { %34 = dma.hbm_to_vmem [thread:$0]  %s492_s1, 64, %s32_s26, [#allocation8]  }
  0x19   :  { %420 = dma.done.wait [#allocation5], 256  }
  0x1a   :  { %421 = vsyncadd [#allocation5], 4294967040 }
  0x1b   :  { %422 = dma.done.wait [#allocation8], 64  }
  0x1c   :  { %423 = vsyncadd [#allocation8], 4294967232  ;;  %vm63_vm0 = vcmask 1043456   ;;  %v54_v0 = vld [vmem:[#allocation4] sm:$0xff]  ;;  %v55_v1 = vld [vmem:[#allocation4 + $0x8] sm:$0xff]  ;;  %vm51_vm1 = vcmask 25600   ;;  %v76_v19 = vlaneseq }
  0x1d   :  { %v59_v2 = vcombine.high %v54_v0, %v54_v0  ;;  %v93_v3 = vsel %vm63_vm0, %v54_v0, 0.0  ;;  %v64_v4 = vsel %vm63_vm0, %v54_v0, -inf  ;;  %v60_v5 = vcombine.high %v55_v1, %v55_v1  ;;  %v128_v18 = vld [vmem:[#allocation7] sm:$0xf]  ;;  %v129_v42 = vld [vmem:[%s494_s3] sm:$0xf] }
  0x1e   :  { %v98_v6 = vsel %vm63_vm0, %v55_v1, 0.0  ;;  %v69_v7 = vsel %vm63_vm0, %v55_v1, -inf  ;;  %v430_v16 = vmov -inf   ;;  %v431_v17 = vmov 0.0   ;;  %v325_v43 = vld [vmem:[%s493_s2] ss:$0 sm:$0xff] }
  0x1f   :  { %v94_v8 = vsel %vm63_vm0, %v59_v2, 0.0  ;;  %v65_v9 = vsel %vm63_vm0, %v59_v2, -inf  ;;  %v99_v10 = vsel %vm63_vm0, %v60_v5, 0.0  ;;  %v70_v11 = vsel %vm63_vm0, %v60_v5, -inf  ;;  %52 = vst.msk [vmem:[#allocation2] sm:$0x3] %vm51_vm1, %v430_v16  ;;  %336 = vmatprep.subr.mxu0 %v431_v17  ;;  %341 = vmatprep.subr.mxu1 %v431_v17 }
  0x20   :  { %v95_v12 = vadd.f32 %v94_v8, %v93_v3  ;;  %v66_v13 = vmax.f32 %v64_v4, %v65_v9  ;;  %v100_v14 = vadd.f32 %v99_v10, %v98_v6  ;;  %v71_v15 = vmax.f32 %v69_v7, %v70_v11  ;;  %53 = vst.msk [vmem:[#allocation3] sm:$0x3] %vm51_vm1, %v431_v17  ;;  %v328_v48 = vld [vmem:[%s495_s4] ss:$0 sm:$0xff]  ;;  %s433_s2 = smov [#allocation9]  }
  0x21   :  { %vm138_vm2 = vcmask 31744   ;;  %vm432_vm3 = vmmov 0   ;;  %v77_v20 = vand.u32 127, %v76_v19  ;;  %v79_v21 = vshrl.u32 %v76_v19, 7  ;;  %s315_s3 = sshll.u32 %s433_s2, 4  ;;  %s316_s3 = int_to_ptr.vmem [resolvable:$true] %s315_s3 }
  0x22   :  { %96 = vadd.xlane.f32.xlu0 %v95_v12  ;;  %67 = vmax.xlane.f32.xlu1 %v66_v13  ;;  %vm86_vm4 = vcmask 1041409   ;;  %vm126_vm5 = vcmask 1041408   ;;  %s400_s9 = scalar_lea.vmem %s316_s3, 32  ;;  %p405_p11 = scmp.lt.s32.totalorder %s316_s3, %s316_s3 }
  0x23   :  { %337 = vmatpush3.xpose.msk.msra.mxu0 %vm138_vm2, %v128_v18  ;;  %338 = vmatprep.mubr.msk.f32.mxu0 %vm432_vm3, %v431_v17  ;;  %v80_v24 = vsub.s32 %v77_v20, %v79_v21  ;;  %p401_p10 = scmp.ne.s32.totalorder %s316_s3, %s400_s9  ;;  %p406_p12 = scmp.lt.s32.totalorder %s400_s9, %s400_s9 }
  0x24   :  { %343 = vmatprep.mubr.msk.f32.mxu1 %vm432_vm3, %v431_v17  ;;  %342 = vmatpush3.xpose.msk.msra.mxu1 %vm138_vm2, %v129_v42 }
  0x25   :  { %p407_p13 = por %p406_p12, %p405_p11 }
  0x26   :  { %101 = vadd.xlane.f32.xlu0 %v100_v14  ;;  %72 = vmax.xlane.f32.xlu1 %v71_v15  ;;  %v56_v30 = vld [vmem:[#allocation2] sm:$0x3] }
  0x27   :  { %v92_v32 = vld [vmem:[#allocation3] sm:$0x3]  ;;  %p408_p0 = pnand %p407_p13, %p401_p10 }
  0xab   :  { %v97_v22 = vpop.xlane.xlu0 %96  ;;  %v68_v23 = vpop.xlane.xlu1 %67 }
  0xac   :  { %v81_v25 = vrot.slane %v68_v23, %v80_v24  ;;  %v108_v28 = vrot.slane %v97_v22, %v80_v24 }
  0xaf   :  { %v102_v26 = vpop.xlane.xlu0 %101  ;;  %v73_v27 = vpop.xlane.xlu1 %72 }
  0xb0   :  { %v112_v29 = vrot.slane %v102_v26, %v80_v24  ;;  %v85_v31 = vrot.slane %v73_v27, %v80_v24 }
  0xb2   :  { %v113_v33 = vsel %vm86_vm4, %v112_v29, %v108_v28  ;;  %v87_v34 = vsel %vm86_vm4, %v85_v31, %v81_v25 }
  0xb3   :  { %v89_v35 = vmax.f32 %v56_v30, %v87_v34  ;;  %v115_v36 = vadd.f32 %v113_v33, %v92_v32 }
  0xb5   :  { %91 = vst.msk [vmem:[#allocation2] sm:$0x3] %vm51_vm1, %v89_v35  ;;  %116 = vst.msk [vmem:[#allocation3] sm:$0x3] %vm51_vm1, %v115_v36 }
  0xbc   :  { %v121_v37 = vld [vmem:[#allocation3] sm:$0x3]  ;;  %v120_v40 = vld [vmem:[#allocation2] sm:$0x3] }
  0xbd   :  { %v122_v38 = vmul.f32 0.00390625, %v121_v37 }
  0xbf   :  { %v124_v39 = vrot.slane %v122_v38, 6 }
  0xc1   :  { %v127_v41 = vsel %vm126_vm5, %v120_v40, %v124_v39 }
  0xc2   :  { %339 = vmatmul.mubr.msk.f32.vlgmr.msra.gmra.mxu0 %vm138_vm2, %v127_v41 }
 0x182   :  { %v211_v44 = vpop.f32.mrf.mxu0 }
 0x183   :  { %v212_v45 = vadd.f32 %v325_v43, %v211_v44 }
 0x184   :  { %v340_v46 = vpop.f32.mrf.mxu0 }
 0x185   :  { %v215_v47 = vmax.f32 %v212_v45, 0.0 }
 0x187   :  { %344 = vmatmul.mubr.msk.f32.vlgmr.msra.gmra.mxu1 %vm138_vm2, %v215_v47 }
 0x247   :  { %v294_v49 = vpop.f32.mrf.mxu1 }
 0x248   :  { %v295_v50 = vadd.f32 %v328_v48, %v294_v49 }
 0x249   :  { %v345_v51 = vpop.f32.mrf.mxu1 }
 0x24a   :  { %v299_v52 = vrot.slane %v295_v50, 2 }
 0x24c   :  { %v301_v53 = vadd.f32 %v299_v52, %v295_v50 }
 0x24e   :  { %v331_v54 = vmul.f32 -1.442695, %v301_v53 }
 0x250   :  { %356 = vpow2.f32 %v331_v54 }
 0x25d   :  { %v357_v55 = vpop.eup %356 }
 0x25e   :  { %v305_v56 = vadd.f32 1.0, %v357_v55 }
 0x260   :  { %358 = vrcp.f32 %v305_v56 }
 0x26d   :  { %v359_v57 = vpop.eup %358 }
 0x26e   :  { %308 = vst.msk [vmem:[#allocation9] sm:$0x3] %vm51_vm1, %v359_v57 }
 0x26f   :  { %411 = shalt.err (!%p408_p0)
}
 0x270   :  { %318 = dma.vmem_to_hbm [thread:$0]  %s316_s3, 32, %s496_s5, [#allocation6]  }
 0x271   :  { %424 = dma.done.wait [#allocation6], 32  }
 0x272   :  { %425 = vsyncadd [#allocation6], 4294967264 }
 0x273   :  { %322 = vsyncpa [#allocation5], 1 }
 0x274   :  { %323 = vsyncpa [#allocation8], 1 }
 0x275   :  { %324 = vsyncpa [#allocation6], 1 }

</bundles_post_ra>
